<compile_context>
chip_gen: v6e
topology: v6e:2x2x1
jax: 0.10.0
libtpu: 0.0.40
codegen_flags: <defaults>
</compile_context>

<pallas_src>
import functools

import jax
import jax.numpy as jnp
from jax.experimental import pallas as pl
from jax.experimental.pallas import tpu as pltpu

# Logical sizes of the MLP.
IN_F = 1
HID = 30
OUT_F = 4
N_LAYERS = 4

# Padded TPU-friendly sizes (sublane=8, lane=128).
PAD_LANES = 128
MIN_ROWS = 8


def _mlp_kernel(x_ref, w_ref, b_ref, o_ref):
    """4-layer MLP on one row-block: 4 (R,128)x(128,128) matmuls + ReLUs.

    x_ref: (R, 128) f32     w_ref: (4, 128, 128) bf16     b_ref: (4, 128) f32
    """
    b_all = b_ref[...]                                    # (4, 128) f32
    h = x_ref[...]                                        # (R, 128) f32
    for k in range(N_LAYERS):
        w_k = w_ref[k]                                    # (128, 128) bf16
        h = jnp.dot(h.astype(jnp.bfloat16), w_k,
                    preferred_element_type=jnp.float32)
        h = h + b_all[k:k + 1, :]                         # f32 bias add
        if k < N_LAYERS - 1:
            h = jnp.maximum(h, 0.0)
    o_ref[...] = h


def _pad2d(a, rows, cols):
    r, c = a.shape
    return jnp.pad(a, ((0, rows - r), (0, cols - c)))


def init_params(key):
    """Deterministic synthetic parameters with the module's shapes.

    Weights are PyTorch-style (out_features, in_features); biases (out_features,).
    """
    dims = [(HID, IN_F), (HID, HID), (HID, HID), (OUT_F, HID)]
    params = []
    for i, (out_f, in_f) in enumerate(dims):
        kw, kb, key = jax.random.split(jax.random.fold_in(key, i), 3)
        scale = 1.0 / jnp.sqrt(jnp.float32(in_f))
        w = jax.random.uniform(kw, (out_f, in_f), jnp.float32, -scale, scale)
        b = jax.random.uniform(kb, (out_f,), jnp.float32, -scale, scale)
        params.append((w, b))
    return params


def prepare_params(params):
    """One-time prep: transpose to (in,out), zero-pad to (128,128), stack, cast.

    Returns (w_stack bf16 (4,128,128), b_stack f32 (4,128)). Done once at init,
    NOT per forward call.
    """
    ws, bs = [], []
    for (w, b) in params:
        w_io = jnp.transpose(w).astype(jnp.float32)                 # (in, out)
        ws.append(_pad2d(w_io, PAD_LANES, PAD_LANES))
        bs.append(_pad2d(b.reshape(1, -1).astype(jnp.float32), 1, PAD_LANES))
    w_stack = jnp.stack(ws, axis=0).astype(jnp.bfloat16)            # (4,128,128)
    b_stack = jnp.concatenate(bs, axis=0)                           # (4,128) f32
    return w_stack, b_stack


@functools.partial(jax.jit, static_argnames=("row_block",))
def _mlp_pallas(x_padded, w_stack, b_stack, *, row_block):
    """Run the kernel over a (B_pad, 128) activation, tiled by row_block."""
    b_pad = x_padded.shape[0]
    grid = (b_pad // row_block,)

    flops = 2 * b_pad * PAD_LANES * PAD_LANES * N_LAYERS
    bytes_accessed = (w_stack.size * 2 + b_stack.size * 4
                      + 2 * b_pad * PAD_LANES * 4)

    return pl.pallas_call(
        _mlp_kernel,
        out_shape=jax.ShapeDtypeStruct((b_pad, PAD_LANES), jnp.float32),
        grid_spec=pltpu.PrefetchScalarGridSpec(
            num_scalar_prefetch=0,
            grid=grid,
            in_specs=[
                pl.BlockSpec((row_block, PAD_LANES), lambda i: (i, 0)),
                pl.BlockSpec((N_LAYERS, PAD_LANES, PAD_LANES),
                             lambda i: (0, 0, 0)),
                pl.BlockSpec((N_LAYERS, PAD_LANES), lambda i: (0, 0)),
            ],
            out_specs=pl.BlockSpec((row_block, PAD_LANES), lambda i: (i, 0)),
        ),
        compiler_params=pltpu.CompilerParams(
            dimension_semantics=("parallel",)),
        cost_estimate=pl.CostEstimate(
            flops=flops, transcendentals=0, bytes_accessed=bytes_accessed),
    )(x_padded, w_stack, b_stack)


def convnet_forward(x, prepared):
    """Module-exact forward: x has exactly 1 element -> (1, 4) f32."""
    x_flat = jnp.reshape(x, (1, -1)).astype(jnp.float32)  # == x.view(1, -1)
    assert x_flat.shape[1] == IN_F, (
        "Linear(1, 30) requires the flattened input to have exactly 1 element")
    x_p = jnp.zeros((MIN_ROWS, PAD_LANES), jnp.float32).at[0, 0].set(x_flat[0, 0])
    out = _mlp_pallas(x_p, *prepared, row_block=MIN_ROWS)
    return out[0:1, 0:OUT_F]


def convnet_forward_batched(samples, prepared, *, row_block=256):
    """Throughput path: `samples` is (B,) scalars, each an independent sample.

    Row-wise identical math to the module applied per-sample; amortizes the
    pallas_call launch + weight DMA across B rows and fills MXU rows.
    """
    samples = jnp.reshape(samples, (-1,)).astype(jnp.float32)
    b = samples.shape[0]
    b_pad = row_block * pl.cdiv(b, row_block)
    x_p = jnp.zeros((b_pad, PAD_LANES), jnp.float32).at[:b, 0].set(samples)
    out = _mlp_pallas(x_p, *prepared, row_block=row_block)
    return out[:b, 0:OUT_F]


def convnet_reference(x, params):
    """Pure-JAX f32 reference matching the PyTorch forward."""
    h = jnp.reshape(x, (1, -1)).astype(jnp.float32)
    for i, (w, b) in enumerate(params):
        h = h @ w.T + b
        if i < len(params) - 1:
            h = jnp.maximum(h, 0.0)
    return h


def convnet_reference_prepared(x, prepared):
    """Reference using the same bf16-rounded weights as the kernel (tight check)."""
    w_stack, b_stack = prepared
    h = jnp.zeros((1, PAD_LANES), jnp.float32)
    h = h.at[0, 0].set(jnp.reshape(x, (-1,))[0].astype(jnp.float32))
    for k in range(N_LAYERS):
        h = jnp.dot(h.astype(jnp.bfloat16), w_stack[k],
                    preferred_element_type=jnp.float32) + b_stack[k:k + 1, :]
        if k < N_LAYERS - 1:
            h = jnp.maximum(h, 0.0)
    return h[:, :OUT_F]


if __name__ == "__main__":
    key = jax.random.PRNGKey(0)
    params = init_params(key)
    prepared = prepare_params(params)            # one-time prep (hoisted)
    prepared = jax.block_until_ready(prepared)

    # --- Module-exact single-sample forward (view(1,-1) -> Linear(1,30)). ---
    x = jax.random.normal(jax.random.fold_in(key, 999), (1, 1), jnp.float32)
    out = jax.block_until_ready(convnet_forward(x, prepared))
    assert out.shape == (1, OUT_F), out.shape

    ref_bf16 = convnet_reference_prepared(x, prepared)   # same bf16 math
    ref_f32 = convnet_reference(x, params)               # full-precision ref
    assert jnp.allclose(out, ref_bf16, atol=1e-4, rtol=1e-4), (out, ref_bf16)
    assert jnp.allclose(out, ref_f32, atol=5e-2, rtol=5e-2), (out, ref_f32)

    # --- Batched throughput path: B independent scalar samples. ---
    B = 512
    xs = jax.random.normal(jax.random.fold_in(key, 123), (B,), jnp.float32)
    out_b = jax.block_until_ready(
        convnet_forward_batched(xs, prepared, row_block=256))
    assert out_b.shape == (B, OUT_F), out_b.shape

    ref_b = jax.vmap(
        lambda s: convnet_reference(s.reshape(1, 1), params)[0])(xs)
    assert jnp.allclose(out_b, ref_b, atol=5e-2, rtol=5e-2)

    print("KERNEL_OK")
</pallas_src>

<mosaic_0001>
module attributes {stable_mosaic.version = 11 : i64} {
  func.func @_mlp_kernel(%arg0: i32, %arg1: memref<8x128xf32, #tpu.memory_space<vmem>>, %arg2: memref<4x128x128xbf16, #tpu.memory_space<vmem>>, %arg3: memref<4x128xf32, #tpu.memory_space<vmem>>, %arg4: memref<8x128xf32, #tpu.memory_space<vmem>>) attributes {dimension_semantics = [#tpu.dimension_semantics<parallel>], iteration_bounds = array<i64: 1>, scalar_prefetch = 0 : i64, scratch_operands = 0 : i64, tpu.core_type = #tpu.core_type<tc>, window_params = [{transform_indices = @transform_0, window_bounds = array<i64: 8, 128>}, {pipeline_mode = #tpu.pipeline_mode<synchronous>, transform_indices = @transform_1, window_bounds = array<i64: 4, 128, 128>}, {pipeline_mode = #tpu.pipeline_mode<synchronous>, transform_indices = @transform_2, window_bounds = array<i64: 4, 128>}, {transform_indices = @transform_3, window_bounds = array<i64: 8, 128>}]} {
    %c0 = arith.constant 0 : index
    %c0_0 = arith.constant 0 : index
    %0 = vector.load %arg3[%c0, %c0_0] : memref<4x128xf32, #tpu.memory_space<vmem>>, vector<4x128xf32>
    %c0_1 = arith.constant 0 : index
    %c0_2 = arith.constant 0 : index
    %1 = vector.load %arg1[%c0_1, %c0_2] : memref<8x128xf32, #tpu.memory_space<vmem>>, vector<8x128xf32>
    %c0_3 = arith.constant 0 : index
    %c0_4 = arith.constant 0 : index
    %c0_5 = arith.constant 0 : index
    %2 = vector.load %arg2[%c0_3, %c0_4, %c0_5] : memref<4x128x128xbf16, #tpu.memory_space<vmem>>, vector<1x128x128xbf16>
    %3 = vector.shape_cast %2 : vector<1x128x128xbf16> to vector<128x128xbf16>
    %4 = arith.truncf %1 : vector<8x128xf32> to vector<8x128xbf16>
    %cst = arith.constant dense<0.000000e+00> : vector<8x128xf32>
    %5 = tpu.matmul %4, %3, %cst {dimension_numbers = #tpu.dot_dimension_numbers<[1], [0], [0], [1], [0, 0, 1, 1], [], []>} : vector<8x128xbf16>, vector<128x128xbf16>, vector<8x128xf32> -> vector<8x128xf32>
    %6 = vector.extract_strided_slice %0 {offsets = [0, 0], sizes = [1, 128], strides = [1, 1]} : vector<4x128xf32> to vector<1x128xf32>
    %7 = vector.broadcast %6 : vector<1x128xf32> to vector<8x128xf32>
    %8 = arith.addf %5, %7 : vector<8x128xf32>
    %cst_6 = arith.constant 0.000000e+00 : f32
    %9 = vector.broadcast %cst_6 : f32 to vector<8x128xf32>
    %10 = arith.maximumf %8, %9 : vector<8x128xf32>
    %c1 = arith.constant 1 : index
    %c0_7 = arith.constant 0 : index
    %c0_8 = arith.constant 0 : index
    %11 = vector.load %arg2[%c1, %c0_7, %c0_8] : memref<4x128x128xbf16, #tpu.memory_space<vmem>>, vector<1x128x128xbf16>
    %12 = vector.shape_cast %11 : vector<1x128x128xbf16> to vector<128x128xbf16>
    %13 = arith.truncf %10 : vector<8x128xf32> to vector<8x128xbf16>
    %cst_9 = arith.constant dense<0.000000e+00> : vector<8x128xf32>
    %14 = tpu.matmul %13, %12, %cst_9 {dimension_numbers = #tpu.dot_dimension_numbers<[1], [0], [0], [1], [0, 0, 1, 1], [], []>} : vector<8x128xbf16>, vector<128x128xbf16>, vector<8x128xf32> -> vector<8x128xf32>
    %15 = vector.extract_strided_slice %0 {offsets = [1, 0], sizes = [1, 128], strides = [1, 1]} : vector<4x128xf32> to vector<1x128xf32>
    %16 = vector.broadcast %15 : vector<1x128xf32> to vector<8x128xf32>
    %17 = arith.addf %14, %16 : vector<8x128xf32>
    %cst_10 = arith.constant 0.000000e+00 : f32
    %18 = vector.broadcast %cst_10 : f32 to vector<8x128xf32>
    %19 = arith.maximumf %17, %18 : vector<8x128xf32>
    %c2 = arith.constant 2 : index
    %c0_11 = arith.constant 0 : index
    %c0_12 = arith.constant 0 : index
    %20 = vector.load %arg2[%c2, %c0_11, %c0_12] : memref<4x128x128xbf16, #tpu.memory_space<vmem>>, vector<1x128x128xbf16>
    %21 = vector.shape_cast %20 : vector<1x128x128xbf16> to vector<128x128xbf16>
    %22 = arith.truncf %19 : vector<8x128xf32> to vector<8x128xbf16>
    %cst_13 = arith.constant dense<0.000000e+00> : vector<8x128xf32>
    %23 = tpu.matmul %22, %21, %cst_13 {dimension_numbers = #tpu.dot_dimension_numbers<[1], [0], [0], [1], [0, 0, 1, 1], [], []>} : vector<8x128xbf16>, vector<128x128xbf16>, vector<8x128xf32> -> vector<8x128xf32>
    %24 = vector.extract_strided_slice %0 {offsets = [2, 0], sizes = [1, 128], strides = [1, 1]} : vector<4x128xf32> to vector<1x128xf32>
    %25 = vector.broadcast %24 : vector<1x128xf32> to vector<8x128xf32>
    %26 = arith.addf %23, %25 : vector<8x128xf32>
    %cst_14 = arith.constant 0.000000e+00 : f32
    %27 = vector.broadcast %cst_14 : f32 to vector<8x128xf32>
    %28 = arith.maximumf %26, %27 : vector<8x128xf32>
    %c3 = arith.constant 3 : index
    %c0_15 = arith.constant 0 : index
    %c0_16 = arith.constant 0 : index
    %29 = vector.load %arg2[%c3, %c0_15, %c0_16] : memref<4x128x128xbf16, #tpu.memory_space<vmem>>, vector<1x128x128xbf16>
    %30 = vector.shape_cast %29 : vector<1x128x128xbf16> to vector<128x128xbf16>
    %31 = arith.truncf %28 : vector<8x128xf32> to vector<8x128xbf16>
    %cst_17 = arith.constant dense<0.000000e+00> : vector<8x128xf32>
    %32 = tpu.matmul %31, %30, %cst_17 {dimension_numbers = #tpu.dot_dimension_numbers<[1], [0], [0], [1], [0, 0, 1, 1], [], []>} : vector<8x128xbf16>, vector<128x128xbf16>, vector<8x128xf32> -> vector<8x128xf32>
    %33 = vector.extract_strided_slice %0 {offsets = [3, 0], sizes = [1, 128], strides = [1, 1]} : vector<4x128xf32> to vector<1x128xf32>
    %34 = vector.broadcast %33 : vector<1x128xf32> to vector<8x128xf32>
    %35 = arith.addf %32, %34 : vector<8x128xf32>
    %c0_18 = arith.constant 0 : index
    %c0_19 = arith.constant 0 : index
    %36 = vector.load %arg4[%c0_18, %c0_19] : memref<8x128xf32, #tpu.memory_space<vmem>>, vector<8x128xf32>
    tpu.vector_store %arg4[%c0_18, %c0_19], %35 {strides = array<i32>} : memref<8x128xf32, #tpu.memory_space<vmem>>, vector<8x128xf32>,
    return
  }
  func.func @transform_0(%arg0: i32) -> (i32, i32) {
    %c0_i32 = arith.constant 0 : i32
    %c0_i32_0 = arith.constant 0 : i32
    return %arg0, %c0_i32 : i32, i32
  }
  func.func @transform_1(%arg0: i32) -> (i32, i32, i32) {
    %c0_i32 = arith.constant 0 : i32
    %c0_i32_0 = arith.constant 0 : i32
    %c0_i32_1 = arith.constant 0 : i32
    %c0_i32_2 = arith.constant 0 : i32
    return %c0_i32, %c0_i32_0, %c0_i32_1 : i32, i32, i32
  }
  func.func @transform_2(%arg0: i32) -> (i32, i32) {
    %c0_i32 = arith.constant 0 : i32
    %c0_i32_0 = arith.constant 0 : i32
    %c0_i32_1 = arith.constant 0 : i32
    return %c0_i32, %c0_i32_0 : i32, i32
  }
  func.func @transform_3(%arg0: i32) -> (i32, i32) {
    %c0_i32 = arith.constant 0 : i32
    %c0_i32_0 = arith.constant 0 : i32
    return %arg0, %c0_i32 : i32, i32
  }
}

</mosaic_0001>

<bundles_post_ra>
// kernel: _mlp_pallas.1
= control target key start
LH: loop header
LB: loop body
LE: loop exit
PB: predicated region body
PF: predicated region fallthrough
CT: control target
= control target key end

     0   :  { %8 = vsyncpa [#allocation3], 0  ;;  %s874_s0 = inlined_call_operand.hbm [shape: f32[8,128], index: 0, kind: input, shape index: {}]   ;;  %s875_s1 = inlined_call_operand.hbm [shape: bf16[4,128,128], index: 1, kind: input, shape index: {}]   ;;  %s876_s2 = inlined_call_operand.hbm [shape: f32[4,128], index: 2, kind: input, shape index: {}]   ;;  %s877_s3 = inlined_call_operand.hbm [shape: f32[8,128], index: 3, kind: output, shape index: {}]  }
   0x1   :  { %9 = vsyncpa [#allocation6], 0 }
   0x2   :  { %10 = vsyncpa [#allocation4], 0  ;;  %s788_s12 = smov [#allocation5]  }
   0x3   :  { %s26_s13 = sshll.u32 %s788_s12, 4  ;;  %s27_s13 = int_to_ptr.vmem [resolvable:$true] %s26_s13 }
   0x4   :  { %s710_s14 = scalar_lea.vmem %s27_s13, 4096  ;;  %p715_p1 = scmp.lt.s32.totalorder %s27_s13, %s27_s13 }
   0x5   :  { %p711_p0 = scmp.ne.s32.totalorder %s27_s13, %s710_s14  ;;  %p716_p2 = scmp.lt.s32.totalorder %s710_s14, %s710_s14 }
   0x7   :  { %p717_p3 = por %p716_p2, %p715_p1 }
   0x9   :  { %p718_p4 = pnand %p717_p3, %p711_p0 }
   0xb   :  { %721 = shalt.err (!%p718_p4)
}
   0xc   :  { %s789_s15 = smov 64   ;;  %s790_s16 = smov 4  }
   0xd   :  { %32 = dma.hbm_to_vmem [thread:$0]  %s875_s1, 4096, %s27_s13, [#allocation6], %s789_s15, %s789_s15, %s790_s16  }
   0xe   :  { %s791_s19 = smov [#allocation2]   ;;  %s792_s21 = smov [#allocation7]  }
   0xf   :  { %s17_s20 = sshll.u32 %s791_s19, 4  ;;  %s39_s22 = sshll.u32 %s792_s21, 4  ;;  %s18_s20 = int_to_ptr.vmem [resolvable:$true] %s17_s20  ;;  %s40_s22 = int_to_ptr.vmem [resolvable:$true] %s39_s22 }
  0x10   :  { %s730_s23 = scalar_lea.vmem %s18_s20, 128  ;;  %p735_p6 = scmp.lt.s32.totalorder %s18_s20, %s18_s20 }
  0x11   :  { %p731_p5 = scmp.ne.s32.totalorder %s18_s20, %s730_s23  ;;  %p736_p7 = scmp.lt.s32.totalorder %s730_s23, %s730_s23 }
  0x13   :  { %p737_p8 = por %p736_p7, %p735_p6 }
  0x15   :  { %p738_p9 = pnand %p737_p8, %p731_p5 }
  0x17   :  { %741 = shalt.err (!%p738_p9)
}
  0x18   :  { %20 = dma.hbm_to_vmem [thread:$0]  %s874_s0, 128, %s18_s20, [#allocation3]  }
  0x19   :  { %s750_s26 = scalar_lea.vmem %s40_s22, 64  ;;  %p755_p11 = scmp.lt.s32.totalorder %s40_s22, %s40_s22 }
  0x1a   :  { %p751_p10 = scmp.ne.s32.totalorder %s40_s22, %s750_s26  ;;  %p756_p12 = scmp.lt.s32.totalorder %s750_s26, %s750_s26 }
  0x1c   :  { %p757_p13 = por %p756_p12, %p755_p11 }
  0x1e   :  { %p758_p0 = pnand %p757_p13, %p751_p10 }
  0x20   :  { %761 = shalt.err (!%p758_p0)
}
  0x21   :  { %42 = dma.hbm_to_vmem [thread:$0]  %s876_s2, 64, %s40_s22, [#allocation6]  }
  0x22   :  { %782 = dma.done.wait [#allocation3], 128  }
  0x23   :  { %783 = vsyncadd [#allocation3], 4294967168 }
  0x24   :  { %784 = dma.done.wait [#allocation6], 4160  }
  0x25   :  { %785 = vsyncadd [#allocation6], 4294963136  ;;  %v793_v0 = vmov 0.0   ;;  %vm794_vm0 = vmmov 0   ;;  %v670_v1 = vld [vmem:[#allocation5 + $0x38] sm:$0xff]   ;;  %v671_v2 = vld [vmem:[#allocation5 + $0x30] sm:$0xff]   ;;  %v72_v25 = vlaneseq }
  0x26   :  { %582 = vmatprep.subr.bf16.mxu0 %v793_v0  ;;  %598 = vmatprep.mubr.msk.bf16.mxu0 %vm794_vm0, %v793_v0  ;;  %v672_v3 = vld [vmem:[#allocation5 + $0x28] sm:$0xff]   ;;  %v678_v4 = vld [vmem:[#allocation5 + $0x78] sm:$0xff]   ;;  %v673_v5 = vld [vmem:[#allocation5 + $0x20] sm:$0xff]   ;;  %s795_s0 = smov [#allocation8]  }
  0x27   :  { %602 = vmatprep.subr.bf16.mxu1 %v793_v0  ;;  %618 = vmatprep.mubr.msk.bf16.mxu1 %vm794_vm0, %v793_v0  ;;  %v679_v6 = vld [vmem:[#allocation5 + $0x70] sm:$0xff]   ;;  %v674_v7 = vld [vmem:[#allocation5 + $0x18] sm:$0xff]   ;;  %v680_v8 = vld [vmem:[#allocation5 + $0x68] sm:$0xff]   ;;  %v855_v26 = vshrl.u32 %v72_v25, 7  ;;  %s504_s2 = sshll.u32 %s795_s0, 4  ;;  %s505_s2 = int_to_ptr.vmem [resolvable:$true] %s504_s2 }
  0x28   :  { %583 = vmatpush3.bf16.msra.mxu0 %v670_v1  ;;  %603 = vmatpush3.bf16.msra.mxu1 %v678_v4  ;;  %v675_v9 = vld [vmem:[#allocation5 + $0x10] sm:$0xff]   ;;  %v681_v10 = vld [vmem:[#allocation5 + $0x60] sm:$0xff]   ;;  %v676_v11 = vld [vmem:[#allocation5 + $0x8] sm:$0xff]   ;;  %s762_s28 = scalar_lea.vmem %s505_s2, 128  ;;  %p767_p2 = scmp.lt.s32.totalorder %s505_s2, %s505_s2 }
  0x29   :  { %584 = vmatprep.subr.bf16.mxu0 %v793_v0  ;;  %604 = vmatprep.subr.bf16.mxu1 %v793_v0  ;;  %v682_v12 = vld [vmem:[#allocation5 + $0x58] sm:$0xff]   ;;  %v677_v13 = vld [vmem:[#allocation5] sm:$0xff]   ;;  %v683_v15 = vld [vmem:[#allocation5 + $0x50] sm:$0xff]   ;;  %v74_v27 = vsub.s32 0, %v855_v26  ;;  %v185_v45 = vsub.s32 1, %v855_v26  ;;  %v296_v56 = vsub.s32 2, %v855_v26  ;;  %p763_p1 = scmp.ne.s32.totalorder %s505_s2, %s762_s28  ;;  %p768_p3 = scmp.lt.s32.totalorder %s762_s28, %s762_s28 }
  0x2a   :  { %v54_v14 = vld [vmem:[#allocation2] sm:$0xff]  ;;  %v684_v17 = vld [vmem:[#allocation5 + $0x48] sm:$0xff]   ;;  %v685_v18 = vld [vmem:[#allocation5 + $0x40] sm:$0xff]  }
  0x2b   :  { %v71_v16 = vpack.c.bf16 %v54_v14, %v54_v14  ;;  %v686_v19 = vld [vmem:[#allocation5 + $0xb8] sm:$0xff]   ;;  %v687_v20 = vld [vmem:[#allocation5 + $0xb0] sm:$0xff]   ;;  %v688_v21 = vld [vmem:[#allocation5 + $0xa8] sm:$0xff]   ;;  %p769_p4 = por %p768_p3, %p767_p2 }
  0x2c   :  { %585 = vmatpush3.bf16.msra.mxu0 %v671_v2  ;;  %605 = vmatpush3.bf16.msra.mxu1 %v679_v6  ;;  %v689_v22 = vld [vmem:[#allocation5 + $0xa0] sm:$0xff]   ;;  %v690_v23 = vld [vmem:[#allocation5 + $0x98] sm:$0xff]   ;;  %v691_v24 = vld [vmem:[#allocation5 + $0x90] sm:$0xff]   ;;  %v407_v2 = vsub.s32 3, %v855_v26 }
  0x2d   :  { %586 = vmatprep.subr.bf16.mxu0 %v793_v0  ;;  %606 = vmatprep.subr.bf16.mxu1 %v793_v0  ;;  %v53_v28 = vld [vmem:[#allocation7] sm:$0xf]  ;;  %v692_v37 = vld [vmem:[#allocation5 + $0x88] sm:$0xff]   ;;  %v694_v39 = vld [vmem:[#allocation5 + $0xf8] sm:$0xff]   ;;  %p770_p5 = pnand %p769_p4, %p763_p1 }
  0x2e   :  { %v75_v29 = vrot.slane %v53_v28, %v74_v27  ;;  %v693_v38 = vld [vmem:[#allocation5 + $0x80] sm:$0xff]   ;;  %v695_v40 = vld [vmem:[#allocation5 + $0xf0] sm:$0xff]   ;;  %v696_v41 = vld [vmem:[#allocation5 + $0xe8] sm:$0xff]   ;;  %v186_v46 = vrot.slane %v53_v28, %v185_v45  ;;  %v297_v57 = vrot.slane %v53_v28, %v296_v56 }
  0x2f   :  { %v697_v42 = vld [vmem:[#allocation5 + $0xe0] sm:$0xff]   ;;  %v698_v43 = vld [vmem:[#allocation5 + $0xd8] sm:$0xff]   ;;  %v699_v44 = vld [vmem:[#allocation5 + $0xd0] sm:$0xff]  }
  0x30   :  { %587 = vmatpush3.bf16.msra.mxu0 %v672_v3  ;;  %607 = vmatpush3.bf16.msra.mxu1 %v680_v8  ;;  %v700_v54 = vld [vmem:[#allocation5 + $0xc8] sm:$0xff]   ;;  %v701_v55 = vld [vmem:[#allocation5 + $0xc0] sm:$0xff]   ;;  %v408_v3 = vrot.slane %v53_v28, %v407_v2 }
  0x31   :  { %588 = vmatprep.subr.bf16.mxu0 %v793_v0  ;;  %608 = vmatprep.subr.bf16.mxu1 %v793_v0 }
  0x34   :  { %589 = vmatpush3.bf16.msra.mxu0 %v673_v5  ;;  %609 = vmatpush3.bf16.msra.mxu1 %v681_v10 }
  0x35   :  { %590 = vmatprep.subr.bf16.mxu0 %v793_v0  ;;  %610 = vmatprep.subr.bf16.mxu1 %v793_v0 }
  0x38   :  { %591 = vmatpush3.bf16.msra.mxu0 %v674_v7  ;;  %611 = vmatpush3.bf16.msra.mxu1 %v682_v12 }
  0x39   :  { %592 = vmatprep.subr.bf16.mxu0 %v793_v0  ;;  %612 = vmatprep.subr.bf16.mxu1 %v793_v0 }
  0x3c   :  { %593 = vmatpush3.bf16.msra.mxu0 %v675_v9  ;;  %613 = vmatpush3.bf16.msra.mxu1 %v683_v15 }
  0x3d   :  { %594 = vmatprep.subr.bf16.mxu0 %v793_v0  ;;  %614 = vmatprep.subr.bf16.mxu1 %v793_v0 }
  0x40   :  { %595 = vmatpush3.bf16.msra.mxu0 %v676_v11  ;;  %615 = vmatpush3.bf16.msra.mxu1 %v684_v17 }
  0x41   :  { %596 = vmatprep.subr.bf16.mxu0 %v793_v0  ;;  %616 = vmatprep.subr.bf16.mxu1 %v793_v0 }
  0x44   :  { %597 = vmatpush3.bf16.msra.mxu0 %v677_v13  ;;  %617 = vmatpush3.bf16.msra.mxu1 %v685_v18 }
  0x45   :  { %622 = vmatprep.subr.bf16.mxu0 %v793_v0  ;;  %642 = vmatprep.subr.bf16.mxu1 %v793_v0 }
  0x47   :  { %599 = vmatmul.mubr.bf16.vlgmr.msra.gmra.mxu0 %v71_v16 }
  0x48   :  { %638 = vmatprep.mubr.msk.bf16.mxu0 %vm794_vm0, %v793_v0  ;;  %623 = vmatpush3.bf16.msra.mxu0 %v686_v19 }
  0x49   :  { %624 = vmatprep.subr.bf16.mxu0 %v793_v0 }
  0x4c   :  { %625 = vmatpush3.bf16.msra.mxu0 %v687_v20 }
  0x4d   :  { %626 = vmatprep.subr.bf16.mxu0 %v793_v0 }
  0x50   :  { %627 = vmatpush3.bf16.msra.mxu0 %v688_v21 }
  0x51   :  { %628 = vmatprep.subr.bf16.mxu0 %v793_v0 }
  0x54   :  { %629 = vmatpush3.bf16.msra.mxu0 %v689_v22 }
  0x55   :  { %630 = vmatprep.subr.bf16.mxu0 %v793_v0 }
  0x58   :  { %631 = vmatpush3.bf16.msra.mxu0 %v690_v23 }
  0x59   :  { %632 = vmatprep.subr.bf16.mxu0 %v793_v0 }
  0x5c   :  { %633 = vmatpush3.bf16.msra.mxu0 %v691_v24 }
  0x5d   :  { %634 = vmatprep.subr.bf16.mxu0 %v793_v0 }
  0x60   :  { %635 = vmatpush3.bf16.msra.mxu0 %v692_v37 }
  0x61   :  { %636 = vmatprep.subr.bf16.mxu0 %v793_v0 }
  0x64   :  { %637 = vmatpush3.bf16.msra.mxu0 %v693_v38 }
 0x107   :  { %v158_v30 = vpop.f32.mrf.mxu0 }
 0x108   :  { %v159_v31 = vadd.f32 %v158_v30, %v75_v29 }
 0x109   :  { %v600_v32 = vpop.f32.mrf.mxu0 }
 0x10a   :  { %v164_v33 = vmax.f32 %v159_v31, 0.0 }
 0x10b   :  { %v161_v34 = vpop.f32.mrf.mxu0 }
 0x10c   :  { %v182_v35 = vpack.c.bf16 %v164_v33, %v164_v33 }
 0x10d   :  { %v601_v36 = vpop.f32.mrf.mxu0 }
 0x10e   :  { %619 = vmatmul.mubr.bf16.vlgmr.msra.gmra.mxu1 %v182_v35 }
 0x10f   :  { %658 = vmatprep.mubr.msk.bf16.mxu1 %vm794_vm0, %v793_v0  ;;  %643 = vmatpush3.bf16.msra.mxu1 %v694_v39 }
 0x110   :  { %644 = vmatprep.subr.bf16.mxu1 %v793_v0 }
 0x113   :  { %645 = vmatpush3.bf16.msra.mxu1 %v695_v40 }
 0x114   :  { %646 = vmatprep.subr.bf16.mxu1 %v793_v0 }
 0x117   :  { %647 = vmatpush3.bf16.msra.mxu1 %v696_v41 }
 0x118   :  { %648 = vmatprep.subr.bf16.mxu1 %v793_v0 }
 0x11b   :  { %649 = vmatpush3.bf16.msra.mxu1 %v697_v42 }
 0x11c   :  { %650 = vmatprep.subr.bf16.mxu1 %v793_v0 }
 0x11f   :  { %651 = vmatpush3.bf16.msra.mxu1 %v698_v43 }
 0x120   :  { %652 = vmatprep.subr.bf16.mxu1 %v793_v0 }
 0x123   :  { %653 = vmatpush3.bf16.msra.mxu1 %v699_v44 }
 0x124   :  { %654 = vmatprep.subr.bf16.mxu1 %v793_v0 }
 0x127   :  { %655 = vmatpush3.bf16.msra.mxu1 %v700_v54 }
 0x128   :  { %656 = vmatprep.subr.bf16.mxu1 %v793_v0 }
 0x12b   :  { %657 = vmatpush3.bf16.msra.mxu1 %v701_v55 }
 0x1ce   :  { %v269_v47 = vpop.f32.mrf.mxu1 }
 0x1cf   :  { %v270_v48 = vadd.f32 %v269_v47, %v186_v46 }
 0x1d0   :  { %v620_v49 = vpop.f32.mrf.mxu1 }
 0x1d1   :  { %v275_v50 = vmax.f32 %v270_v48, 0.0 }
 0x1d2   :  { %v272_v51 = vpop.f32.mrf.mxu1 }
 0x1d3   :  { %v293_v52 = vpack.c.bf16 %v275_v50, %v275_v50 }
 0x1d4   :  { %v621_v53 = vpop.f32.mrf.mxu1 }
 0x1d5   :  { %639 = vmatmul.mubr.bf16.vlgmr.msra.gmra.mxu0 %v293_v52 }
 0x295   :  { %v380_v58 = vpop.f32.mrf.mxu0 }
 0x296   :  { %v381_v59 = vadd.f32 %v380_v58, %v297_v57 }
 0x297   :  { %v640_v60 = vpop.f32.mrf.mxu0 }
 0x298   :  { %v386_v61 = vmax.f32 %v381_v59, 0.0 }
 0x299   :  { %v383_v62 = vpop.f32.mrf.mxu0 }
 0x29a   :  { %v404_v63 = vpack.c.bf16 %v386_v61, %v386_v61 }
 0x29b   :  { %v641_v1 = vpop.f32.mrf.mxu0 }
 0x29c   :  { %659 = vmatmul.mubr.bf16.vlgmr.msra.gmra.mxu1 %v404_v63 }
 0x35c   :  { %v491_v4 = vpop.f32.mrf.mxu1 }
 0x35d   :  { %v492_v0 = vadd.f32 %v491_v4, %v408_v3 }
 0x35e   :  { %v660_v5 = vpop.f32.mrf.mxu1 }
 0x35f   :  { %497 = vst [vmem:[#allocation8] sm:$0xff] %v492_v0 }
 0x360   :  { %v494_v6 = vpop.f32.mrf.mxu1 }
 0x361   :  { %773 = shalt.err (!%p770_p5)
}
 0x362   :  { %507 = dma.vmem_to_hbm [thread:$0]  %s505_s2, 128, %s877_s3, [#allocation4]   ;;  %v661_v7 = vpop.f32.mrf.mxu1 }
 0x363   :  { %786 = dma.done.wait [#allocation4], 128  }
 0x364   :  { %787 = vsyncadd [#allocation4], 4294967168 }
 0x365   :  { %511 = vsyncpa [#allocation3], 1 }
 0x366   :  { %512 = vsyncpa [#allocation6], 1 }
 0x367   :  { %513 = vsyncpa [#allocation4], 1 }

</bundles_post_ra>
